<compile_context>
chip_gen: v7x
topology: tpu7x:2x2x1
jax: 0.10.0
libtpu: 0.0.40
codegen_flags: <defaults>
</compile_context>

<pallas_src>
import functools

import numpy as np
import jax
import jax.numpy as jnp
from jax.experimental import pallas as pl
from jax.experimental.pallas import tpu as pltpu


def _gaussian_taps_np(smooth_sd):
    """scipy.signal.gaussian(1 + 6*sd, sd), normalized to sum to 1 (numpy)."""
    if smooth_sd is None:
        return np.ones((1,), np.float32)
    m = 1 + 6 * smooth_sd
    n = np.arange(m, dtype=np.float64)
    c = (m - 1) / 2.0
    w = np.exp(-0.5 * ((n - c) / float(smooth_sd)) ** 2)
    return (w / w.sum()).astype(np.float32)


def _band_matrix_np(taps, t_tile):
    """(t_tile, t_tile + 2P) banded matrix S with S[r, r+k] = taps[k]."""
    K = int(taps.size)
    P = K // 2
    S = np.zeros((t_tile, t_tile + 2 * P), np.float32)
    rows = np.arange(t_tile)
    for k in range(K):
        S[rows, rows + k] = taps[k]
    return S


def _smooth_noise_kernel(*refs, T, N, P, K, t_tile, use_wn, use_off,
                         white_sd, off_sd):
    # Ref order: x, S, [white_noise], [offset_noise], out, xpad_scratch
    idx = 0
    x_ref = refs[idx]; idx += 1          # VMEM (T, N)          raw spikes (one batch elem)
    s_ref = refs[idx]; idx += 1          # VMEM (tT, tT+2P)     constant banded Gaussian taps
    wn_ref = None
    off_ref = None
    if use_wn:
        wn_ref = refs[idx]; idx += 1     # VMEM (T, N)          standard-normal white noise
    if use_off:
        off_ref = refs[idx]; idx += 1    # VMEM (1, N)          standard-normal offset noise
    out_ref = refs[idx]; idx += 1        # VMEM (T, N)          output
    xpad_ref = refs[idx]                 # VMEM (T+2P, N) f32   zero-padded staging scratch

    # Stage the spike block into the zero-padded f32 scratch (in-kernel 'same'
    # conv halo; no jnp.pad / no extra HBM array).
    if P > 0:
        zeros_p = jnp.zeros((P, N), jnp.float32)
        xpad_ref[0:P, :] = zeros_p
        xpad_ref[P + T:T + 2 * P, :] = zeros_p
    xpad_ref[P:P + T, :] = x_ref[...].astype(jnp.float32)

    off = None
    if use_off:
        off = off_sd * off_ref[...].astype(jnp.float32)   # (1, N), broadcast over T

    n_tiles = (T + t_tile - 1) // t_tile
    for i in range(n_tiles):                       # static, unrolled
        t0 = i * t_tile
        tl = min(t_tile, T - t0)                   # last tile may be shorter (static)
        window = xpad_ref[t0:t0 + tl + 2 * P, :]   # (tl + 2P, N) incl. halo
        if K > 1:
            # Depthwise 'same' Gaussian conv over time as a banded matmul (MXU).
            y = jnp.dot(s_ref[0:tl, 0:tl + 2 * P], window,
                        preferred_element_type=jnp.float32,
                        precision=jax.lax.Precision.HIGHEST)
        else:
            y = window                              # no smoothing (identity filter)
        if use_wn:
            y = y + white_sd * wn_ref[t0:t0 + tl, :].astype(jnp.float32)
        if use_off:
            y = y + off
        out_ref[t0:t0 + tl, :] = y.astype(out_ref.dtype)


def smooth_and_noise(spikes, *, smooth_sd=2, noise=True, white_noise_sd=0.1,
                     constant_offset_sd=0.05, training=True, seed=0,
                     time_tile=256):
    """Pallas implementation of SmoothAndNoise.forward for (B, T, N) spikes.

    Note: noise is drawn with jax.random (not bit-exact with torch.randn);
    vary `seed` across training steps.
    """
    B, T, N = spikes.shape
    out_dtype = spikes.dtype if jnp.issubdtype(spikes.dtype, jnp.floating) \
        else jnp.float32

    taps = _gaussian_taps_np(smooth_sd)            # numpy constants (baked into S)
    K = int(taps.size)
    P = K // 2
    t_tile = int(min(T, time_tile))
    S = jnp.asarray(_band_matrix_np(taps, t_tile))  # (tT, tT + 2P)

    use_wn = bool(noise and training and (white_noise_sd is not None))
    use_off = bool(noise and training and (constant_offset_sd is not None))

    kernel = functools.partial(
        _smooth_noise_kernel, T=T, N=N, P=P, K=K, t_tile=t_tile,
        use_wn=use_wn, use_off=use_off,
        white_sd=float(white_noise_sd) if use_wn else 0.0,
        off_sd=float(constant_offset_sd) if use_off else 0.0)

    batch_spec = pl.BlockSpec((None, T, N), lambda b: (b, 0, 0))
    in_specs = [
        batch_spec,                                                 # spikes
        pl.BlockSpec((t_tile, t_tile + 2 * P), lambda b: (0, 0)),   # band matrix (constant)
    ]
    inputs = [spikes, S]

    key = jax.random.PRNGKey(int(seed))
    if use_wn or use_off:
        k_wn, k_off = jax.random.split(key)
        if use_wn:
            wn = jax.random.normal(k_wn, (B, T, N), jnp.float32)
            in_specs.append(batch_spec)
            inputs.append(wn)
        if use_off:
            off = jax.random.normal(k_off, (B, 1, N), jnp.float32)
            in_specs.append(pl.BlockSpec((None, 1, N), lambda b: (b, 0, 0)))
            inputs.append(off)

    # Explicit VMEM budget (double-buffered in/out + noise + scratch + S + temporaries).
    in_b = int(jnp.dtype(spikes.dtype).itemsize)
    out_b = int(jnp.dtype(out_dtype).itemsize)
    vmem_est = (2 * T * N * in_b + 2 * T * N * out_b
                + (2 * T * N * 4 if use_wn else 0) + (2 * N * 4 if use_off else 0)
                + (T + 2 * P) * N * 4 + 2 * S.size * 4 + 4 * t_tile * N * 4)
    vmem_limit = int(min(max(2 * vmem_est, 32 << 20), 64 << 20))

    out = pl.pallas_call(
        kernel,
        out_shape=jax.ShapeDtypeStruct((B, T, N), out_dtype),
        grid=(B,),
        in_specs=in_specs,
        out_specs=pl.BlockSpec((None, T, N), lambda b: (b, 0, 0)),
        scratch_shapes=[pltpu.VMEM((T + 2 * P, N), jnp.float32)],
        compiler_params=pltpu.CompilerParams(
            dimension_semantics=("parallel",),
            vmem_limit_bytes=vmem_limit),
    )(*inputs)
    return out


if __name__ == "__main__":
    # Small shapes consistent with the module's (B, T, N) forward.
    # N = 128 keeps the output lane-dense (full 128-wide vector stores).
    B, T, N = 2, 16, 128
    smooth_sd = 2                                  # -> K = 13 taps

    key = jax.random.PRNGKey(0)
    spikes = jax.random.poisson(key, 2.0, (B, T, N)).astype(jnp.float32)

    # 1) Deterministic path (noise off) vs pure-JAX reference of the 'same' conv.
    out_clean = jax.block_until_ready(
        smooth_and_noise(spikes, smooth_sd=smooth_sd, noise=False, training=True))
    taps = jnp.asarray(_gaussian_taps_np(smooth_sd))
    K = int(taps.shape[0])
    P = K // 2
    xpad = jnp.pad(spikes, ((0, 0), (P, P), (0, 0)))
    ref = sum(taps[k] * xpad[:, k:k + T, :] for k in range(K))
    assert out_clean.shape == (B, T, N)
    err = float(jnp.max(jnp.abs(out_clean.astype(jnp.float32) - ref)))
    assert err < 2e-2, err

    # 2) Training path with noise: statistical sanity of the noise terms.
    out_noisy = jax.block_until_ready(
        smooth_and_noise(spikes, smooth_sd=smooth_sd, noise=True,
                         white_noise_sd=0.1, constant_offset_sd=0.05,
                         training=True, seed=1234))
    resid = (out_noisy - out_clean).astype(jnp.float32)
    assert bool(jnp.all(jnp.isfinite(resid)))
    r_std = float(jnp.std(resid))                  # expected ~sqrt(0.1^2+0.05^2) ~ 0.112
    r_mean = float(jnp.mean(resid))
    assert 0.05 < r_std < 0.25, r_std
    assert abs(r_mean) < 0.05, r_mean

    # Different seeds give different noise.
    out_noisy2 = jax.block_until_ready(
        smooth_and_noise(spikes, smooth_sd=smooth_sd, noise=True,
                         training=True, seed=999))
    assert float(jnp.max(jnp.abs(out_noisy2 - out_noisy))) > 1e-3

    # Eval / noise-off paths add no noise.
    out_eval = jax.block_until_ready(
        smooth_and_noise(spikes, smooth_sd=smooth_sd, noise=True, training=False))
    assert float(jnp.max(jnp.abs(out_eval - out_clean))) == 0.0

    print("KERNEL_OK")
</pallas_src>

<mosaic_0001>
module attributes {stable_mosaic.version = 11 : i64} {
  func.func @_smooth_noise_kernel(%arg0: i32, %arg1: memref<1x16x128xf32, #tpu.memory_space<vmem>>, %arg2: memref<16x28xf32, #tpu.memory_space<vmem>>, %arg3: memref<1x16x128xf32, #tpu.memory_space<vmem>>, %arg4: memref<28x128xf32, #tpu.memory_space<vmem>>) attributes {dimension_semantics = [#tpu.dimension_semantics<parallel>], iteration_bounds = array<i64: 2>, scalar_prefetch = 0 : i64, scratch_operands = 1 : i64, tpu.core_type = #tpu.core_type<tc>, window_params = [{transform_indices = @transform_0, window_bounds = array<i64: 1, 16, 128>}, {pipeline_mode = #tpu.pipeline_mode<synchronous>, transform_indices = @transform_1, window_bounds = array<i64: 16, 28>}, {transform_indices = @transform_2, window_bounds = array<i64: 1, 16, 128>}]} {
    %cst = arith.constant 0.000000e+00 : f32
    %0 = vector.broadcast %cst : f32 to vector<6x128xf32>
    %c0 = arith.constant 0 : index
    %c0_0 = arith.constant 0 : index
    %1 = vector.load %arg4[%c0, %c0_0] : memref<28x128xf32, #tpu.memory_space<vmem>>, vector<6x128xf32>
    tpu.vector_store %arg4[%c0, %c0_0], %0 {strides = array<i32>} : memref<28x128xf32, #tpu.memory_space<vmem>>, vector<6x128xf32>,
    %c22 = arith.constant 22 : index
    %c0_1 = arith.constant 0 : index
    %2 = vector.load %arg4[%c22, %c0_1] : memref<28x128xf32, #tpu.memory_space<vmem>>, vector<6x128xf32>
    tpu.vector_store %arg4[%c22, %c0_1], %0 {strides = array<i32>} : memref<28x128xf32, #tpu.memory_space<vmem>>, vector<6x128xf32>,
    %c0_2 = arith.constant 0 : index
    %c0_3 = arith.constant 0 : index
    %c0_4 = arith.constant 0 : index
    %3 = vector.load %arg1[%c0_2, %c0_3, %c0_4] : memref<1x16x128xf32, #tpu.memory_space<vmem>>, vector<1x16x128xf32>
    %4 = vector.shape_cast %3 : vector<1x16x128xf32> to vector<16x128xf32>
    %c6 = arith.constant 6 : index
    %c0_5 = arith.constant 0 : index
    %5 = vector.load %arg4[%c6, %c0_5] : memref<28x128xf32, #tpu.memory_space<vmem>>, vector<16x128xf32>
    tpu.vector_store %arg4[%c6, %c0_5], %4 {strides = array<i32>} : memref<28x128xf32, #tpu.memory_space<vmem>>, vector<16x128xf32>,
    %c0_6 = arith.constant 0 : index
    %c0_7 = arith.constant 0 : index
    %6 = vector.load %arg4[%c0_6, %c0_7] : memref<28x128xf32, #tpu.memory_space<vmem>>, vector<28x128xf32>
    %c0_8 = arith.constant 0 : index
    %c0_9 = arith.constant 0 : index
    %7 = vector.load %arg2[%c0_8, %c0_9] : memref<16x28xf32, #tpu.memory_space<vmem>>, vector<16x28xf32>
    %cst_10 = arith.constant dense<0.000000e+00> : vector<16x128xf32>
    %8 = tpu.matmul %7, %6, %cst_10 {dimension_numbers = #tpu.dot_dimension_numbers<[1], [0], [0], [1], [0, 0, 1, 1], [], []>, precision = #tpu.contract_precision<fp32>} : vector<16x28xf32>, vector<28x128xf32>, vector<16x128xf32> -> vector<16x128xf32>
    %c0_11 = arith.constant 0 : index
    %c0_12 = arith.constant 0 : index
    %c0_13 = arith.constant 0 : index
    %9 = vector.load %arg3[%c0_11, %c0_12, %c0_13] : memref<1x16x128xf32, #tpu.memory_space<vmem>>, vector<1x16x128xf32>
    %10 = vector.shape_cast %9 : vector<1x16x128xf32> to vector<16x128xf32>
    %11 = vector.shape_cast %8 : vector<16x128xf32> to vector<1x16x128xf32>
    tpu.vector_store %arg3[%c0_11, %c0_12, %c0_13], %11 {strides = array<i32>} : memref<1x16x128xf32, #tpu.memory_space<vmem>>, vector<1x16x128xf32>,
    return
  }
  func.func @transform_0(%arg0: i32) -> (i32, i32, i32) {
    %c0_i32 = arith.constant 0 : i32
    %c0_i32_0 = arith.constant 0 : i32
    %c0_i32_1 = arith.constant 0 : i32
    return %arg0, %c0_i32, %c0_i32_0 : i32, i32, i32
  }
  func.func @transform_1(%arg0: i32) -> (i32, i32) {
    %c0_i32 = arith.constant 0 : i32
    %c0_i32_0 = arith.constant 0 : i32
    %c0_i32_1 = arith.constant 0 : i32
    return %c0_i32, %c0_i32_0 : i32, i32
  }
  func.func @transform_2(%arg0: i32) -> (i32, i32, i32) {
    %c0_i32 = arith.constant 0 : i32
    %c0_i32_0 = arith.constant 0 : i32
    %c0_i32_1 = arith.constant 0 : i32
    return %arg0, %c0_i32, %c0_i32_0 : i32, i32, i32
  }
}

</mosaic_0001>

<bundles_post_ra>
// kernel: tpu_custom_call.1
= control target key start
LH: loop header
LB: loop body
LE: loop exit
PB: predicated region body
PF: predicated region fallthrough
CT: control target
= control target key end

     0   :  { %7 = vsyncpa [#allocation4], 0  ;;  %s1453_s0 = inlined_call_operand.hbm [shape: f32[2,16,128], index: 0, kind: input, shape index: {}]   ;;  %s1454_s1 = inlined_call_operand.hbm [shape: f32[16,28], index: 1, kind: input, shape index: {}]   ;;  %s1455_s2 = inlined_call_operand.hbm [shape: f32[2,16,128], index: 2, kind: output, shape index: {}]  }
   0x1   :  { %9 = vsyncpa [#allocation4 + $0x1], 0 }
   0x2   :  { %10 = vsyncpa [#allocation7], 0 }
   0x3   :  { %11 = vsyncpa [#allocation5], 0 }
   0x4   :  { %13 = vsyncpa [#allocation5 + $0x1], 0  ;;  %s1220_s9 = smov 0   ;;  %s1222_s10 = smov 0  }
   0x5   :  { %s1224_s11 = smov 0   ;;  %s1226_s12 = smov 0  }
   0x6 LB: > { %s1241_s13 = sadd.s32 4294967295, %s1195_s12   ;;  %s827_s14 = sadd.s32 4294967294, %s1195_s12   ;;  %s1195_s12 = sphi %s1226_s12, %s1475_s12   ;;  %s1191_s11 = sphi %s1224_s11, %s1474_s11   ;;  %s1187_s10 = sphi %s1222_s10, %s1473_s10   ;;  %s1183_s9 = sphi %s1220_s9, %s1472_s9  }
   0x7   : > { %p39_p0 = scmp.ne.s32.totalorder %s1187_s10, %s1183_s9  ;;  %p1456_p1 = scmp.eq.s32.totalorder %s1241_s13, 0 }
   0x8   : > { %p90_p3 = scmp.eq.s32.totalorder %s827_s14, 1  ;;  %p828_p5 = scmp.ge.s32.totalorder %s1195_s12, 1 }
   0x9   : > { %p1250_p4 = por %p1456_p1, %p39_p0  ;;  %p97_p7 = scmp.lt.s32.totalorder %s1195_s12, 3 }
   0xa   : > { %p1255_p6 = por %p90_p3, %p39_p0  ;;  %s1197_s18 = smov [#allocation6]  }
   0xb   : > { %s1459_s15 = scalar_select %p1250_p4, 1, 0 }
   0xc   : > { %s1460_s16 = scalar_select %p1255_p6, 1, 0 }
   0xd   : > { %p1260_p8 = pnand %p828_p5, %p97_p7  ;;  %s109_s19 = sshll.u32 %s1197_s18, 4  ;;  %s1264_s19 = int_to_ptr.vmem [resolvable:$true] %s109_s19 }
   0xe   : > { %s1276_s21 = sadd.s32 1, %s1195_s12   ;;  %s26_s22 = sadd.s32 1, %s1191_s11 }
   0xf   : > { %s1461_s17 = scalar_select %p1260_p8, 1, 0 }
  0x10   : > { %p1013_p9 = pneg %p1260_p8  ;;  %s23_s23 = ssub.s32 %s1195_s12, %s1276_s21 }
  0x11   : > { %s1067_s26 = scalar_lea.hbm %s1454_s1, 256 }
  0x12   : > { %p1271_p11 = pnand %p1013_p9, %p1456_p1  ;;  %p1068_p12 = scmp.ne.s32.totalorder %s1454_s1, %s1067_s26 }
  0x13   : > { %p1074_p5 = scmp.lt.u32.totalorder %s1067_s26, %s1454_s1 }
  0x14   : > { %p1069_p13 = pneg %p1271_p11 }
  0x16   : > { %p1070_p0 = pnand %p1069_p13, %p1068_p12 }
  0x18   : > { %p1071_p3 = pneg %p1070_p0 }
  0x1a   : > { %p1076_p7 = pnand %p1074_p5, %p1071_p3 }
  0x1c   : > { %1079 = shalt.err (!%p1076_p7)
}
  0x1d   : > { %s1080_s3 = scalar_lea.vmem %s1264_s19, 256  ;;  %p1088_p2 = scmp.lt.s32.totalorder %s1264_s19, %s1264_s19 }
  0x1e   : > { %p1081_p9 = scmp.ne.s32.totalorder %s1264_s19, %s1080_s3  ;;  %p1089_p6 = scmp.lt.s32.totalorder %s1080_s3, %s1080_s3 }
  0x20   : > { %p1083_p10 = pnand %p1081_p9, %p1069_p13  ;;  %p1090_p4 = por %p1089_p6, %p1088_p2 }
  0x22   : > { %p1084_p1 = pneg %p1083_p10 }
  0x24   : > { %p1091_p8 = pnand %p1090_p4, %p1084_p1 }
  0x26   : > { %1094 = shalt.err (!%p1091_p8)
}
  0x27   : > { %s1198_s4 = smov 128   ;;  %s1199_s5 = smov 8  }
  0x28   : > { %1016 = dma.hbm_to_vmem [thread:$0]  (!%p1271_p11), %s1454_s1, 256, %s1264_s19, [#allocation7], %s1198_s4, %s1198_s4, %s1199_s5  }
  0x29   : > { %p24_p1 = scmp.eq.s32.totalorder %s23_s23, 0  ;;  %p33_p2 = scmp.ne.s32.totalorder %s1191_s11, %s1187_s10 }
  0x2a   : > { %p34_p4 = scmp.eq.s32.totalorder %s1195_s12, 0  ;;  %p1026_p6 = scmp.lt.s32.totalorder %s1195_s12, 2 }
  0x2b   : > { %s1310_s8 = scalar_select %p24_p1, %s1191_s11, %s26_s22  }
  0x2c   : > { %p35_p8 = por %p34_p4, %p33_p2  ;;  %p1463_p10 = scmp.eq.s32.totalorder %s1241_s13, 1 }
  0x2d   : > { %s123_s18 = sand.u32 1, %s1191_s11   ;;  %s843_s20 = sshll.u32 %s1195_s12, 8 }
  0x2e   : > { %p1314_p12 = por %p1463_p10, %p33_p2  ;;  %s831_s24 = sshll.u32 %s123_s18, 4 }
  0x2f   : > { %s1323_s27 = scalar_lea.hbm %s1453_s0, %s843_s20  ;;  %s127_s19 = scalar_lea.vmem [#allocation3], %s831_s24 }
  0x30   : > { %s134_s22 = sshll.u32 %s127_s19, 4  ;;  %p1325_p11 = pnand %p1026_p6, %p35_p8  ;;  %s1329_s22 = int_to_ptr.vmem [resolvable:$true] %s134_s22 }
  0x31   : > { %s1331_s28 = scalar_lea.sflag [#allocation4], %s123_s18  ;;  %s1095_s29 = scalar_lea.hbm %s1323_s27, 256 }
  0x32   : > { %p1096_p13 = scmp.ne.s32.totalorder %s1323_s27, %s1095_s29  ;;  %p1097_p0 = pneg %p1325_p11 }
  0x33   : > { %s1100_s6 = scalar_lea.hbm %s1453_s0, 512  ;;  %p1101_p7 = scmp.lt.u32.totalorder %s1323_s27, %s1453_s0 }
  0x34   : > { %p1098_p3 = pnand %p1097_p0, %p1096_p13  ;;  %p1102_p9 = scmp.lt.u32.totalorder %s1100_s6, %s1095_s29 }
  0x35   : > { %p1104_p2 = scmp.lt.u32.totalorder %s1095_s29, %s1323_s27 }
  0x36   : > { %p1099_p5 = pneg %p1098_p3  ;;  %p1103_p1 = por %p1102_p9, %p1101_p7 }
  0x38   : > { %p1105_p4 = por %p1104_p2, %p1103_p1 }
  0x3a   : > { %p1106_p6 = pnand %p1105_p4, %p1099_p5 }
  0x3c   : > { %1109 = shalt.err (!%p1106_p6)
}
  0x3d   : > { %s1110_s18 = scalar_lea.vmem %s1329_s22, 256  ;;  %s1200_s24 = smov [#allocation3]  }
  0x3e   : > { %p1111_p8 = scmp.ne.s32.totalorder %s1329_s22, %s1110_s18  ;;  %s1115_s25 = sshll.u32 %s1200_s24, 4  ;;  %s1116_s25 = int_to_ptr.vmem [resolvable:$false] %s1115_s25 }
  0x3f   : > { %s1117_s26 = scalar_lea.vmem %s1116_s25, 512  ;;  %p1118_p3 = scmp.lt.s32.totalorder %s1329_s22, %s1116_s25 }
  0x40   : > { %p1113_p10 = pnand %p1111_p8, %p1097_p0  ;;  %p1119_p7 = scmp.lt.s32.totalorder %s1117_s26, %s1110_s18 }
  0x42   : > { %p1114_p13 = pneg %p1113_p10  ;;  %p1120_p9 = por %p1119_p7, %p1118_p3 }
  0x44   : > { %p1121_p1 = pnand %p1120_p9, %p1114_p13 }
  0x46   : > { %1124 = shalt.err (!%p1121_p1)
}
  0x47   : > { %1020 = dma.hbm_to_vmem [thread:$0]  (!%p1325_p11), %s1323_s27, 256, %s1329_s22, %s1331_s28, %s1198_s4, %s1198_s4, %s1199_s5  }
  0x48   : > { %p1466_p0 = scmp.ne.s32.totalorder %s1461_s17, 0 }
  0x49   : > { %s1365_s19 = sand.u32 (!%p1466_p0), 1, %s1187_s10   ;;  %p1467_p5 = scmp.ne.s32.totalorder (!%p1466_p0), %s1459_s15, 0 }
  0x4a   : > { %146 = sbr.rel (%p1466_p0) target bundleno = 355 (0x163), region = 28  ;;  %s835_s29 = sshll.u32 (!%p1466_p0), %s1365_s19, 4 }
  0x4b   : > { %s149_s30 = scalar_lea.sflag (!%p1466_p0), [#allocation4], %s1365_s19  ;;  %s152_s23 = scalar_lea.vmem (!%p1466_p0), [#allocation3], %s835_s29 }
  0x51   : > { %1170 = dma.done.wait (%p1467_p5), %s149_s30, 256  }
  0x52   : > { %1172 = vsyncadd (%p1467_p5), %s149_s30, 4294967040  ;;  %p1468_p11 = scmp.eq.s32.totalorder %s1241_s13, 0 }
  0x54   : > { %1174 = dma.done.wait (%p1468_p11), [#allocation7], 256   ;;  %p1469_p2 = pmov %p1468_p11 }
  0x55   : > { %v1201_v0 = vmov 0.0   ;;  %vm189_vm0 = vcmask 228352   ;;  %vm196_vm1 = vcmask 1043456   ;;  %v179_v1 = vld [vmem:[%s152_s23] sm:$0xff]  ;;  %v180_v2 = vld [vmem:[%s152_s23 + $0x8] sm:$0xff]  ;;  %s176_s15 = scalar_lea.vmem [#allocation8], %s835_s29 }
  0x56   : > { %1176 = vsyncadd (%p1469_p2), [#allocation7], 4294967040  ;;  %177 = vst [vmem:[#allocation2] sm:$0x3f] %v1201_v0  ;;  %v187_v3 = vld [vmem:[#allocation6] sm:$0xff]  ;;  %v188_v5 = vld [vmem:[#allocation6 + $0x8] sm:$0xff] }
  0x57   : > { %178 = vst [vmem:[#allocation2 + $0x16] sm:$0x3f] %v1201_v0  ;;  %181 = vst [vmem:[#allocation2 + $0x6] sm:$0xff] %v179_v1  ;;  %v191_v6 = vsel %vm189_vm0, %v187_v3, 0  ;;  %v194_v8 = vsel %vm189_vm0, %v188_v5, 0  ;;  %s744_s17 = sshll.u32 %s176_s15, 4  ;;  %s1404_s17 = int_to_ptr.vmem [resolvable:$true] %s744_s17 }
  0x58   : > { %182 = vst [vmem:[#allocation2 + $0xe] sm:$0xff] %v180_v2  ;;  %v1379_v9 = vand.u32 4294901760, %v191_v6  ;;  %v1381_v11 = vand.u32 4294901760, %v194_v8  ;;  %s844_s4 = sshll.u32 %s1241_s13, 8  ;;  %s731_s28 = scalar_lea.sflag [#allocation5], %s1365_s19 }
  0x59   : > { %s1409_s22 = scalar_lea.hbm %s1455_s2, %s844_s4  ;;  %s1125_s13 = scalar_lea.vmem %s1404_s17, 256 }
  0x5a   : > { %v1384_v12 = vsub.f32 %v191_v6, %v1379_v9  ;;  %v1387_v13 = vsub.f32 %v194_v8, %v1381_v11  ;;  %p1126_p4 = scmp.ne.s32.totalorder %s1404_s17, %s1125_s13  ;;  %s1202_s3 = smov [#allocation8]  }
  0x5b   : > { %s1129_s6 = sshll.u32 %s1202_s3, 4  ;;  %s1130_s6 = int_to_ptr.vmem [resolvable:$false] %s1129_s6 }
  0x5c   : > { %v271_v15 = vand.u32 4294901760, %v1384_v12  ;;  %v281_v24 = vand.u32 4294901760, %v1387_v13  ;;  %p1127_p6 = pnand %p1126_p4, %p1314_p12  ;;  %s1131_s7 = scalar_lea.vmem %s1130_s6, 512 }
  0x5d   : > { %p1132_p10 = scmp.lt.s32.totalorder %s1404_s17, %s1130_s6  ;;  %p1133_p13 = scmp.lt.s32.totalorder %s1131_s7, %s1125_s13 }
  0x5e   : > { %v186_v4 = vld [vmem:[#allocation2 + $0x18] sm:$0xf]  ;;  %v183_v16 = vld [vmem:[#allocation2] sm:$0xff]  ;;  %v272_v19 = vsub.f32 %v1384_v12, %v271_v15  ;;  %922 = vmatprep.mubr.f32.mxu0 %v271_v15  ;;  %v282_v32 = vsub.f32 %v1387_v13, %v281_v24  ;;  %p1128_p8 = pneg %p1127_p6 }
  0x5f   : > { %v198_v7 = vsel %vm196_vm1, %v186_v4, 0  ;;  %v184_v17 = vld [vmem:[#allocation2 + $0x8] sm:$0xff]  ;;  %v185_v18 = vld [vmem:[#allocation2 + $0x10] sm:$0xff]  ;;  %v201_v21 = vand.u32 4294901760, %v183_v16  ;;  %p1134_p3 = por %p1133_p13, %p1132_p10 }
  0x60   : > { %v210_v10 = vand.u32 4294901760, %v198_v7  ;;  %v204_v22 = vand.u32 4294901760, %v184_v17  ;;  %v207_v23 = vand.u32 4294901760, %v185_v18  ;;  %v273_v25 = vand.u32 4294901760, %v272_v19 }
  0x61   : > { %v291_v28 = vsub.f32 %v183_v16, %v201_v21  ;;  %v283_v41 = vand.u32 4294901760, %v282_v32  ;;  %p1135_p7 = pnand %p1134_p3, %p1128_p8 }
  0x62   : > { %v312_v14 = vsub.f32 %v198_v7, %v210_v10  ;;  %v947_v26 = vpack.c.bf16 %v204_v22, %v201_v21  ;;  %v951_v27 = vpack.c.bf16 %v210_v10, %v207_v23  ;;  %889 = vmatprep.mubr.f32.mxu1 %v273_v25  ;;  %v298_v29 = vsub.f32 %v184_v17, %v204_v22 }
  0x63   : > { %v305_v30 = vsub.f32 %v185_v18, %v207_v23  ;;  %v292_v33 = vand.u32 4294901760, %v291_v28 }
  0x64   : > { %v313_v20 = vand.u32 4294901760, %v312_v14  ;;  %948 = vmatprep.subr.bf16.mxu1 %v947_v26  ;;  %972 = vmatprep.subr.bf16.mxu0 %v947_v26  ;;  %v299_v34 = vand.u32 4294901760, %v298_v29  ;;  %v963_v48 = vpack.c.bf16 %v298_v29, %v291_v28 }
  0x65   : > { %950 = vmatpush3.bf16.msra.mxu1 %v947_v26  ;;  %974 = vmatpush3.bf16.msra.mxu0 %v947_v26  ;;  %v306_v35 = vand.u32 4294901760, %v305_v30  ;;  %v293_v36 = vsub.f32 %v291_v28, %v292_v33  ;;  %v967_v49 = vpack.c.bf16 %v312_v14, %v305_v30 }
  0x66   : > { %v314_v31 = vsub.f32 %v312_v14, %v313_v20  ;;  %952 = vmatprep.subr.bf16.mxu1 %v951_v27  ;;  %976 = vmatprep.subr.bf16.mxu0 %v951_v27  ;;  %v300_v37 = vsub.f32 %v298_v29, %v299_v34  ;;  %v979_v38 = vpack.c.bf16 %v299_v34, %v292_v33 }
  0x67   : > { %v307_v39 = vsub.f32 %v305_v30, %v306_v35  ;;  %v294_v42 = vand.u32 4294901760, %v293_v36  ;;  %v983_v45 = vpack.c.bf16 %v313_v20, %v306_v35 }
  0x68   : > { %v315_v40 = vand.u32 4294901760, %v314_v31  ;;  %v301_v43 = vand.u32 4294901760, %v300_v37 }
  0x69   : > { %954 = vmatpush3.bf16.msra.mxu1 %v951_v27  ;;  %978 = vmatpush3.bf16.msra.mxu0 %v951_v27  ;;  %v308_v44 = vand.u32 4294901760, %v307_v39 }
  0x6a   : > { %980 = vmatprep.subr.bf16.mxu0 %v979_v38  ;;  %v955_v46 = vpack.c.bf16 %v301_v43, %v294_v42 }
  0x6b   : > { %v959_v47 = vpack.c.bf16 %v315_v40, %v308_v44 }
  0x6c   : > { %890 = vmatmul.mubr.f32.vlgmr.msra.gmra.mrb[0].mxu1 %v283_v41  ;;  %923 = vmatmul.mubr.f32.vlgmr.msra.gmra.mrb[0].mxu0 %v281_v24 }
  0x6d   : > { %956 = vmatprep.subr.bf16.mxu1 %v955_v46  ;;  %982 = vmatpush3.bf16.msra.mxu0 %v979_v38 }
  0x6e   : > { %958 = vmatpush3.bf16.msra.mxu1 %v955_v46  ;;  %984 = vmatprep.subr.bf16.mxu0 %v983_v45 }
  0x6f   : > { %960 = vmatprep.subr.bf16.mxu1 %v959_v47  ;;  %900 = vmatprep.mubr.f32.mxu1 %v1379_v9 }
  0x70   : > { %933 = vmatprep.mubr.f32.mxu0 %v1379_v9 }
  0x71   : > { %986 = vmatpush3.bf16.msra.mxu0 %v983_v45 }
  0x72   : > { %962 = vmatpush3.bf16.msra.mxu1 %v959_v47  ;;  %988 = vmatprep.subr.bf16.mxu0 %v947_v26 }
  0x73   : > { %964 = vmatprep.subr.bf16.mxu1 %v963_v48 }
  0x74   : > { %934 = vmatmul.mubr.f32.vlgmr.msra.gmra.mrb[0].mxu0 %v1381_v11 }
  0x75   : > { %901 = vmatmul.mubr.f32.vlgmr.msra.gmra.mrb[0].mxu1 %v1381_v11  ;;  %990 = vmatpush3.bf16.msra.mxu0 %v947_v26 }
  0x76   : > { %966 = vmatpush3.bf16.msra.mxu1 %v963_v48  ;;  %992 = vmatprep.subr.bf16.mxu0 %v951_v27 }
  0x77   : > { %968 = vmatprep.subr.bf16.mxu1 %v967_v49  ;;  %911 = vmatprep.mubr.f32.mxu1 %v1384_v12 }
  0x78   : > { %944 = vmatprep.mubr.f32.mxu0 %v1379_v9 }
  0x79   : > { %994 = vmatpush3.bf16.msra.mxu0 %v951_v27 }
  0x7a   : > { %970 = vmatpush3.bf16.msra.mxu1 %v967_v49 }
  0x7c   : > { %945 = vmatmul.mubr.f32.vlgmr.msra.gmra.mrb[0].mxu0 %v1381_v11 }
  0x7d   : > { %912 = vmatmul.mubr.f32.vlgmr.msra.gmra.mrb[0].mxu1 %v1387_v13 }
 0x14f   : > { %v946_v50 = vpop.f32.mrb[0].mxu0 }
 0x150   : > { %v913_v51 = vpop.f32.mrb[0].mxu1  ;;  %v718_v52 = vpop.f32.mrb[1].mxu0 }
 0x151   : > { %v995_v53 = vadd.f32 %v946_v50, %v913_v51  ;;  %v462_v54 = vpop.f32.mrb[1].mxu1 }
 0x152   : > { %v996_v55 = vadd.f32 %v718_v52, %v462_v54 }
 0x153   : > { %729 = vst [vmem:[%s176_s15 + $0x8] sm:$0xff] %v995_v53 }
 0x154   : > { %728 = vst [vmem:[%s176_s15] sm:$0xff] %v996_v55 }
 0x155   : > { %1138 = shalt.err (!%p1135_p7)
}
 0x156   : > { %s1139_s20 = scalar_lea.hbm %s1409_s22, 256  ;;  %s1143_s25 = scalar_lea.hbm %s1455_s2, 512 }
 0x157   : > { %p1140_p9 = scmp.ne.s32.totalorder %s1409_s22, %s1139_s20  ;;  %p1144_p5 = scmp.lt.u32.totalorder %s1409_s22, %s1455_s2 }
 0x158   : > { %p1145_p11 = scmp.lt.u32.totalorder %s1143_s25, %s1139_s20  ;;  %p1147_p4 = scmp.lt.u32.totalorder %s1139_s20, %s1409_s22 }
 0x159   : > { %p1141_p1 = pnand %p1140_p9, %p1314_p12 }
 0x15a   : > { %p1146_p2 = por %p1145_p11, %p1144_p5 }
 0x15b   : > { %p1142_p0 = pneg %p1141_p1 }
 0x15c   : > { %p1148_p6 = por %p1147_p4, %p1146_p2 }
 0x15e   : > { %p1149_p8 = pnand %p1148_p6, %p1142_p0 }
 0x160   : > { %1152 = shalt.err (!%p1149_p8)
}
 0x161   : > { %s1203_s30 = smov 128   ;;  %s1204_s23 = smov 8  }
 0x162   : > { %1011 = dma.vmem_to_hbm [thread:$0]  (%p1314_p12), %s1404_s17, 256, %s1409_s22, %s731_s28, %s1203_s30, %s1203_s30, %s1204_s23  }
 0x163 PF: > { %s759_s15 = sand.u32 1, %s1183_s9   ;;  %p1470_p10 = scmp.ne.s32.totalorder %s1460_s16, 0 }
 0x164   : > { %p1471_p13 = scmp.ge.s32.totalorder %s1195_s12, 2  ;;  %s760_s4 = scalar_lea.sflag [#allocation5], %s759_s15 }
 0x166   : > { %p1022_p3 = pnand %p1471_p13, %p1470_p10 }
 0x168   : > { %1178 = dma.done.wait (!%p1022_p3), %s760_s4, 256  }
 0x169   : > { %1180 = vsyncadd (!%p1022_p3), %s760_s4, 4294967040  ;;  %p16_p7 = scmp.ge.s32.totalorder %s1276_s21, 4   ;;  %s1472_s9 = smov %s1187_s10 }
 0x16a   : > { %s1473_s10 = smov %s1191_s11  ;;  %s1474_s11 = smov %s1310_s8 }
 0x16b   : > { %s1475_s12 = smov %s1276_s21  ;;  %18 = sbr.rel (!%p16_p7) target bundleno = 6 (0x6), region = 77 }
 0x172   :  { %765 = vsyncpa [#allocation4], 1 }
 0x173   :  { %767 = vsyncpa [#allocation4 + $0x1], 1 }
 0x174   :  { %768 = vsyncpa [#allocation7], 1 }
 0x175   :  { %769 = vsyncpa [#allocation5], 1 }
 0x176   :  { %771 = vsyncpa [#allocation5 + $0x1], 1 }

</bundles_post_ra>
